<compile_context>
chip_gen: v5e
topology: v5e:2x2
jax: 0.10.0
libtpu: 0.0.40
codegen_flags: <defaults>
</compile_context>

<pallas_src>
import functools

import jax
import jax.numpy as jnp
from jax.experimental import pallas as pl
from jax.experimental.pallas import tpu as pltpu

NEG_SLOPE = 0.01  # nn.LeakyReLU() default negative_slope
LANE = 128        # TPU lane width


def _leaky_relu(x):
    return jnp.where(x > 0, x, NEG_SLOPE * x)


def _round_up(a, b):
    return (a + b - 1) // b * b


def mlp_kernel(x_ref, w0_ref, b0_ref, w1_ref, b1_ref, w2_ref, b2_ref, o_ref):
    """Fused 3-layer MLP forward on one (TB, n_dim) batch tile.

    x/weights are bf16 (MXU-native); accumulation, bias add and LeakyReLU are
    f32; final store is a full 128-lane (zero-padded) tile.
    """
    x = x_ref[...]  # bf16 (TB, n_dim)

    # layer 0: Linear(n_dim, h0) + LeakyReLU   (f32 accumulate / activate)
    h = jnp.dot(x, w0_ref[...], preferred_element_type=jnp.float32) + b0_ref[...]
    h = _leaky_relu(h)

    # layer 1: Linear(h0, h1) + LeakyReLU
    h = jnp.dot(h.astype(w1_ref.dtype), w1_ref[...],
                preferred_element_type=jnp.float32) + b1_ref[...]
    h = _leaky_relu(h)

    # layer 2 (head): Linear(h1, n_obj) zero-padded to 128 lanes, no activation
    o_ref[...] = (
        jnp.dot(h.astype(w2_ref.dtype), w2_ref[...],
                preferred_element_type=jnp.float32) + b2_ref[...]
    ).astype(o_ref.dtype)


@functools.partial(jax.jit, static_argnames=("block_batch",))
def end2end_forward(x, w0, b0, w1, b1, w2, b2, *, block_batch=8192):
    batch, n_dim = x.shape
    h0 = w0.shape[1]
    h1 = w1.shape[1]
    n_obj = w2.shape[1]

    # --- lane-dense output: pad head weight/bias to 128 output columns -------
    n_out_p = _round_up(n_obj, LANE)
    w2p = jnp.zeros((h1, n_out_p), jnp.float32).at[:, :n_obj].set(w2)
    b2p = jnp.zeros((1, n_out_p), jnp.float32).at[:, :n_obj].set(
        b2.reshape(1, n_obj))

    # --- dtypes: bf16 matmul inputs, f32 biases (f32 accumulate in-kernel) ---
    xb = x.astype(jnp.bfloat16)
    w0b = w0.astype(jnp.bfloat16)
    w1b = w1.astype(jnp.bfloat16)
    w2b = w2p.astype(jnp.bfloat16)
    b0f = b0.reshape(1, h0).astype(jnp.float32)
    b1f = b1.reshape(1, h1).astype(jnp.float32)
    b2f = b2p  # already f32, padded

    # --- batch tiling ---------------------------------------------------------
    tb = min(block_batch, _round_up(batch, 8))
    batch_p = _round_up(batch, tb)
    if batch_p != batch:
        xb = jnp.pad(xb, ((0, batch_p - batch), (0, 0)))
    grid = (batch_p // tb,)

    def full_block(arr):
        # weights/biases: full-extent block, same block every grid step
        # -> stays resident in VMEM across the whole grid.
        return pl.BlockSpec(arr.shape, lambda i: (0, 0))

    out = pl.pallas_call(
        mlp_kernel,
        out_shape=jax.ShapeDtypeStruct((batch_p, n_out_p), jnp.float32),
        grid=grid,
        in_specs=[
            pl.BlockSpec((tb, n_dim), lambda i: (i, 0)),   # x: tiled over batch
            full_block(w0b), full_block(b0f),
            full_block(w1b), full_block(b1f),
            full_block(w2b), full_block(b2f),
        ],
        out_specs=pl.BlockSpec((tb, n_out_p), lambda i: (i, 0)),
        # batch axis is embarrassingly parallel -> megacore sharding on v7x.
        # NOTE: with block_batch <= 8192 the double-buffered tiles fit the
        # default scoped-VMEM budget on v5e/v6e/v7x; raise vmem_limit_bytes
        # here only if block_batch is pushed much higher.
        compiler_params=pltpu.CompilerParams(
            dimension_semantics=("parallel",)),
    )(xb, w0b, b0f, w1b, b1f, w2b, b2f)

    return out[:batch, :n_obj]


def init_linear_params(key, in_features, out_features):
    """PyTorch nn.Linear default init: U(-1/sqrt(in), 1/sqrt(in))."""
    kw, kb = jax.random.split(key)
    bound = 1.0 / jnp.sqrt(jnp.float32(in_features))
    # stored transposed: [in_features, out_features]
    w = jax.random.uniform(
        kw, (in_features, out_features), jnp.float32, minval=-bound, maxval=bound
    )
    b = jax.random.uniform(
        kb, (1, out_features), jnp.float32, minval=-bound, maxval=bound
    )
    return w, b


def reference_forward(x, params):
    (w0, b0), (w1, b1), (w2, b2) = params
    h = _leaky_relu(x @ w0 + b0)
    h = _leaky_relu(h @ w1 + b1)
    return h @ w2 + b2


# TODO(synk): save/load/check_model_path_exist are host-side torch checkpoint
# I/O and have no Pallas equivalent; only forward() is implemented.

if __name__ == "__main__":
    # Model config (hidden_size must have length 2: forward indexes
    # activate_functions[0..1]).
    n_dim = 16
    n_obj = 4
    hidden_size = [32, 32]
    batch = 1000          # non-multiple of the tile -> exercises pad + slice
    block_batch = 256     # small tile so the test actually runs a 4-step grid

    key = jax.random.PRNGKey(0)
    kx, k0, k1, k2 = jax.random.split(key, 4)

    x = jax.random.normal(kx, (batch, n_dim), jnp.float32)
    w0, b0 = init_linear_params(k0, n_dim, hidden_size[0])
    w1, b1 = init_linear_params(k1, hidden_size[0], hidden_size[1])
    w2, b2 = init_linear_params(k2, hidden_size[1], n_obj)

    out = end2end_forward(x, w0, b0, w1, b1, w2, b2, block_batch=block_batch)
    out = jax.block_until_ready(out)

    # Verify against a plain-JAX f32 reference of the same forward pass.
    # bf16 matmul inputs (f32 accumulation) -> loosen tolerance vs. f32-only.
    ref = reference_forward(x, [(w0, b0), (w1, b1), (w2, b2)])
    assert out.shape == (batch, n_obj), out.shape
    max_err = float(jnp.max(jnp.abs(out - ref)))
    assert jnp.allclose(out, ref, atol=2e-2, rtol=2e-2), max_err

    print("KERNEL_OK")
</pallas_src>

<mosaic_0001>
module attributes {stable_mosaic.version = 11 : i64} {
  func.func @mlp_kernel(%arg0: i32, %arg1: memref<256x16xbf16, #tpu.memory_space<vmem>>, %arg2: memref<16x32xbf16, #tpu.memory_space<vmem>>, %arg3: memref<1x32xf32, #tpu.memory_space<vmem>>, %arg4: memref<32x32xbf16, #tpu.memory_space<vmem>>, %arg5: memref<1x32xf32, #tpu.memory_space<vmem>>, %arg6: memref<32x128xbf16, #tpu.memory_space<vmem>>, %arg7: memref<1x128xf32, #tpu.memory_space<vmem>>, %arg8: memref<256x128xf32, #tpu.memory_space<vmem>>) attributes {dimension_semantics = [#tpu.dimension_semantics<parallel>], iteration_bounds = array<i64: 4>, scalar_prefetch = 0 : i64, scratch_operands = 0 : i64, tpu.core_type = #tpu.core_type<tc>, window_params = [{transform_indices = @transform_0, window_bounds = array<i64: 256, 16>}, {pipeline_mode = #tpu.pipeline_mode<synchronous>, transform_indices = @transform_1, window_bounds = array<i64: 16, 32>}, {pipeline_mode = #tpu.pipeline_mode<synchronous>, transform_indices = @transform_2, window_bounds = array<i64: 1, 32>}, {pipeline_mode = #tpu.pipeline_mode<synchronous>, transform_indices = @transform_3, window_bounds = array<i64: 32, 32>}, {pipeline_mode = #tpu.pipeline_mode<synchronous>, transform_indices = @transform_4, window_bounds = array<i64: 1, 32>}, {pipeline_mode = #tpu.pipeline_mode<synchronous>, transform_indices = @transform_5, window_bounds = array<i64: 32, 128>}, {pipeline_mode = #tpu.pipeline_mode<synchronous>, transform_indices = @transform_6, window_bounds = array<i64: 1, 128>}, {transform_indices = @transform_7, window_bounds = array<i64: 256, 128>}]} {
    %c0 = arith.constant 0 : index
    %c0_0 = arith.constant 0 : index
    %0 = vector.load %arg1[%c0, %c0_0] : memref<256x16xbf16, #tpu.memory_space<vmem>>, vector<256x16xbf16>
    %c0_1 = arith.constant 0 : index
    %c0_2 = arith.constant 0 : index
    %1 = vector.load %arg2[%c0_1, %c0_2] : memref<16x32xbf16, #tpu.memory_space<vmem>>, vector<16x32xbf16>
    %cst = arith.constant dense<0.000000e+00> : vector<256x32xf32>
    %2 = tpu.matmul %0, %1, %cst {dimension_numbers = #tpu.dot_dimension_numbers<[1], [0], [0], [1], [0, 0, 1, 1], [], []>} : vector<256x16xbf16>, vector<16x32xbf16>, vector<256x32xf32> -> vector<256x32xf32>
    %c0_3 = arith.constant 0 : index
    %c0_4 = arith.constant 0 : index
    %3 = vector.load %arg3[%c0_3, %c0_4] : memref<1x32xf32, #tpu.memory_space<vmem>>, vector<1x32xf32>
    %4 = vector.broadcast %3 : vector<1x32xf32> to vector<256x32xf32>
    %5 = arith.addf %2, %4 : vector<256x32xf32>
    %cst_5 = arith.constant 0.000000e+00 : f32
    %6 = vector.broadcast %cst_5 : f32 to vector<256x32xf32>
    %7 = arith.cmpf ogt, %5, %6 : vector<256x32xf32>
    %cst_6 = arith.constant 0.00999999977 : f32
    %8 = vector.broadcast %cst_6 : f32 to vector<256x32xf32>
    %9 = arith.mulf %8, %5 : vector<256x32xf32>
    %10 = arith.select %7, %5, %9 : vector<256x32xi1>, vector<256x32xf32>
    %11 = arith.truncf %10 : vector<256x32xf32> to vector<256x32xbf16>
    %c0_7 = arith.constant 0 : index
    %c0_8 = arith.constant 0 : index
    %12 = vector.load %arg4[%c0_7, %c0_8] : memref<32x32xbf16, #tpu.memory_space<vmem>>, vector<32x32xbf16>
    %cst_9 = arith.constant dense<0.000000e+00> : vector<256x32xf32>
    %13 = tpu.matmul %11, %12, %cst_9 {dimension_numbers = #tpu.dot_dimension_numbers<[1], [0], [0], [1], [0, 0, 1, 1], [], []>} : vector<256x32xbf16>, vector<32x32xbf16>, vector<256x32xf32> -> vector<256x32xf32>
    %c0_10 = arith.constant 0 : index
    %c0_11 = arith.constant 0 : index
    %14 = vector.load %arg5[%c0_10, %c0_11] : memref<1x32xf32, #tpu.memory_space<vmem>>, vector<1x32xf32>
    %15 = vector.broadcast %14 : vector<1x32xf32> to vector<256x32xf32>
    %16 = arith.addf %13, %15 : vector<256x32xf32>
    %cst_12 = arith.constant 0.000000e+00 : f32
    %17 = vector.broadcast %cst_12 : f32 to vector<256x32xf32>
    %18 = arith.cmpf ogt, %16, %17 : vector<256x32xf32>
    %cst_13 = arith.constant 0.00999999977 : f32
    %19 = vector.broadcast %cst_13 : f32 to vector<256x32xf32>
    %20 = arith.mulf %19, %16 : vector<256x32xf32>
    %21 = arith.select %18, %16, %20 : vector<256x32xi1>, vector<256x32xf32>
    %22 = arith.truncf %21 : vector<256x32xf32> to vector<256x32xbf16>
    %c0_14 = arith.constant 0 : index
    %c0_15 = arith.constant 0 : index
    %23 = vector.load %arg6[%c0_14, %c0_15] : memref<32x128xbf16, #tpu.memory_space<vmem>>, vector<32x128xbf16>
    %cst_16 = arith.constant dense<0.000000e+00> : vector<256x128xf32>
    %24 = tpu.matmul %22, %23, %cst_16 {dimension_numbers = #tpu.dot_dimension_numbers<[1], [0], [0], [1], [0, 0, 1, 1], [], []>} : vector<256x32xbf16>, vector<32x128xbf16>, vector<256x128xf32> -> vector<256x128xf32>
    %c0_17 = arith.constant 0 : index
    %c0_18 = arith.constant 0 : index
    %25 = vector.load %arg7[%c0_17, %c0_18] : memref<1x128xf32, #tpu.memory_space<vmem>>, vector<1x128xf32>
    %26 = vector.broadcast %25 : vector<1x128xf32> to vector<256x128xf32>
    %27 = arith.addf %24, %26 : vector<256x128xf32>
    %c0_19 = arith.constant 0 : index
    %c0_20 = arith.constant 0 : index
    %28 = vector.load %arg8[%c0_19, %c0_20] : memref<256x128xf32, #tpu.memory_space<vmem>>, vector<256x128xf32>
    tpu.vector_store %arg8[%c0_19, %c0_20], %27 {strides = array<i32>} : memref<256x128xf32, #tpu.memory_space<vmem>>, vector<256x128xf32>,
    return
  }
  func.func @transform_0(%arg0: i32) -> (i32, i32) {
    %c0_i32 = arith.constant 0 : i32
    %c0_i32_0 = arith.constant 0 : i32
    return %arg0, %c0_i32 : i32, i32
  }
  func.func @transform_1(%arg0: i32) -> (i32, i32) {
    %c0_i32 = arith.constant 0 : i32
    %c0_i32_0 = arith.constant 0 : i32
    %c0_i32_1 = arith.constant 0 : i32
    return %c0_i32, %c0_i32_0 : i32, i32
  }
  func.func @transform_2(%arg0: i32) -> (i32, i32) {
    %c0_i32 = arith.constant 0 : i32
    %c0_i32_0 = arith.constant 0 : i32
    %c0_i32_1 = arith.constant 0 : i32
    return %c0_i32, %c0_i32_0 : i32, i32
  }
  func.func @transform_3(%arg0: i32) -> (i32, i32) {
    %c0_i32 = arith.constant 0 : i32
    %c0_i32_0 = arith.constant 0 : i32
    %c0_i32_1 = arith.constant 0 : i32
    return %c0_i32, %c0_i32_0 : i32, i32
  }
  func.func @transform_4(%arg0: i32) -> (i32, i32) {
    %c0_i32 = arith.constant 0 : i32
    %c0_i32_0 = arith.constant 0 : i32
    %c0_i32_1 = arith.constant 0 : i32
    return %c0_i32, %c0_i32_0 : i32, i32
  }
  func.func @transform_5(%arg0: i32) -> (i32, i32) {
    %c0_i32 = arith.constant 0 : i32
    %c0_i32_0 = arith.constant 0 : i32
    %c0_i32_1 = arith.constant 0 : i32
    return %c0_i32, %c0_i32_0 : i32, i32
  }
  func.func @transform_6(%arg0: i32) -> (i32, i32) {
    %c0_i32 = arith.constant 0 : i32
    %c0_i32_0 = arith.constant 0 : i32
    %c0_i32_1 = arith.constant 0 : i32
    return %c0_i32, %c0_i32_0 : i32, i32
  }
  func.func @transform_7(%arg0: i32) -> (i32, i32) {
    %c0_i32 = arith.constant 0 : i32
    %c0_i32_0 = arith.constant 0 : i32
    return %arg0, %c0_i32 : i32, i32
  }
}

</mosaic_0001>

<bundles_post_ra>
// kernel: end2end_forward.1
= control target key start
LH: loop header
LB: loop body
LE: loop exit
PB: predicated region body
PF: predicated region fallthrough
CT: control target
= control target key end

     0   :  { %s1400_s24 = smov 0   ;;  %s1647_s0 = inlined_call_operand.vmem [shape: bf16[1024,16], index: 0, kind: input, shape index: {}]   ;;  %s1648_s1 = inlined_call_operand.vmem [shape: bf16[16,32], index: 1, kind: input, shape index: {}]   ;;  %s1649_s2 = inlined_call_operand.vmem [shape: f32[1,32], index: 2, kind: input, shape index: {}]   ;;  %s1650_s3 = inlined_call_operand.vmem [shape: bf16[32,32], index: 3, kind: input, shape index: {}]   ;;  %s1651_s4 = inlined_call_operand.vmem [shape: f32[1,32], index: 4, kind: input, shape index: {}]   ;;  %s1652_s5 = inlined_call_operand.vmem [shape: bf16[32,128], index: 5, kind: input, shape index: {}]   ;;  %s1653_s6 = inlined_call_operand.vmem [shape: f32[1,128], index: 6, kind: input, shape index: {}]   ;;  %s1654_s7 = inlined_call_operand.vmem [shape: f32[1024,128], index: 7, kind: output, shape index: {}]  }
   0x1 LB: > { %s1172_s25 = sadd.s32 4294967295, %s1358_s24   ;;  %p1176_p0 = scmp.ge.s32.totalorder %s1358_s24, 1  ;;  %s1358_s24 = sphi %s1400_s24, %s17_s24  }
   0x2   : > { %p238_p1 = scmp.lt.s32.totalorder %s1358_s24, 5 }
   0x4   : > { %p239_p2 = pnand %p1176_p0, %p238_p1 }
   0x5   : > { %s1177_s28 = sshll.u32 (!%p239_p2), %s1172_s25, 5 }
   0x6   : > { %242 = sbr.rel (%p239_p2) target bundleno = 686 (0x2ae), region = 48  ;;  %p271_p3 = scmp.lt.s32.totalorder (!%p239_p2), %s1177_s28, 127 }
   0xb   : > { %v1331_v0 = vld [vmem:[%s1648_s1] sm:$0xff]  ;;  %s1656_s28 = smov (!%p271_p3, %s1177_s28), 127  ;;  %vm407_vm0 = vcmask 130048   ;;  %v1333_v8 = vld [vmem:[%s1650_s3 + $0x8] sm:$0xff]  ;;  %vm677_vm3 = vcmask 261120  }
   0xc   : > { %463 = vmatpush.bf16.msra.mxu0 %v1331_v0  ;;  %1336 = vmatpush.bf16.msra.mxu3 %v1331_v0  ;;  %s1178_s29 = sshll.u32 %s1656_s28, 2  ;;  %v1332_v9 = vld [vmem:[%s1650_s3] sm:$0xff]  ;;  %s1180_s22 = sshll.u32 %s1656_s28, 3 }
   0xd   : > { %s1417_s9 = scalar_lea.vmem %s1647_s0, %s1178_s29  ;;  %732 = vmatpush.bf16.msra.mxu1 %v1333_v8  ;;  %v1445_v13 = vld [vmem:[%s1649_s2] ss:$0 sm:$0xff]  ;;  %s1557_s29 = scalar_lea.vmem %s1654_s7, %s1180_s22 }
   0xe   : > { %v1315_v1 = vld [vmem:[%s1417_s9] sm:$0xff]  ;;  %v1316_v2 = vld [vmem:[%s1417_s9 + $0x8] sm:$0xff]  ;;  %v1317_v3 = vld [vmem:[%s1417_s9 + $0x10] sm:$0xff] }
   0xf   : > { %1249 = vmatmul.msk.bf16.vlgmr.msra.gmra.mxu0 %vm407_vm0, %v1315_v1  ;;  %v1318_v4 = vld [vmem:[%s1417_s9 + $0x18] sm:$0xff]  ;;  %v1319_v5 = vld [vmem:[%s1417_s9 + $0x20] sm:$0xff]  ;;  %v1320_v6 = vld [vmem:[%s1417_s9 + $0x28] sm:$0xff] }
  0x10   : > { %v1321_v7 = vld [vmem:[%s1417_s9 + $0x30] sm:$0xff]  ;;  %1337 = vmatpush.bf16.msrb.mxu3 %v1333_v8  ;;  %v1322_v10 = vld [vmem:[%s1417_s9 + $0x38] sm:$0xff]  ;;  %v1323_v11 = vld [vmem:[%s1417_s9 + $0x40] sm:$0xff] }
  0x11   : > { %733 = vmatpush.bf16.msra.mxu1 %v1332_v9  ;;  %v1324_v22 = vld [vmem:[%s1417_s9 + $0x48] sm:$0xff]  ;;  %v1325_v32 = vld [vmem:[%s1417_s9 + $0x50] sm:$0xff]  ;;  %v1326_v43 = vld [vmem:[%s1417_s9 + $0x58] sm:$0xff] }
  0x12   : > { %v1328_v34 = vld [vmem:[%s1417_s9 + $0x68] sm:$0xff]  ;;  %v1329_v45 = vld [vmem:[%s1417_s9 + $0x70] sm:$0xff]  ;;  %v1327_v54 = vld [vmem:[%s1417_s9 + $0x60] sm:$0xff] }
  0x13   : > { %1262 = vmatmul.msk.bf16.vlgmr.msra.gmra.mxu3 %vm407_vm0, %v1328_v34  ;;  %v1330_v56 = vld [vmem:[%s1417_s9 + $0x78] sm:$0xff] }
  0x14   : > { %1338 = vmatpush.bf16.msrb.mxu3 %v1332_v9 }
  0x1f   : > { %1250 = vmatmul.msk.bf16.gmra.mxu0 %vm407_vm0, %v1316_v2 }
  0x23   : > { %1263 = vmatmul.msk.bf16.gmra.mxu3 %vm407_vm0, %v1329_v45 }
  0x2f   : > { %1251 = vmatmul.msk.bf16.gmra.mxu0 %vm407_vm0, %v1317_v3 }
  0x33   : > { %1264 = vmatmul.msk.bf16.gmra.mxu3 %vm407_vm0, %v1330_v56 }
  0x3f   : > { %1252 = vmatmul.msk.bf16.gmra.mxu0 %vm407_vm0, %v1318_v4 }
  0x4f   : > { %1253 = vmatmul.msk.bf16.gmra.mxu0 %vm407_vm0, %v1319_v5 }
  0x5f   : > { %1254 = vmatmul.msk.bf16.gmra.mxu0 %vm407_vm0, %v1320_v6 }
  0x6f   : > { %1255 = vmatmul.msk.bf16.gmra.mxu0 %vm407_vm0, %v1321_v7 }
  0x7f   : > { %1256 = vmatmul.msk.bf16.gmra.mxu0 %vm407_vm0, %v1322_v10 }
  0x8c   : > { %v465_v12 = vpop.f32.mrf.mxu0 }
  0x8d   : > { %v466_v14 = vadd.f32 %v1445_v13, %v465_v12 }
  0x8f   : > { %1257 = vmatmul.msk.bf16.gmra.mxu0 %vm407_vm0, %v1323_v11  ;;  %v577_v16 = vmul.f32 0.01, %v466_v14  ;;  %vm545_vm1 = vcmp.gt.f32.partialorder %v466_v14, 0.0 }
  0x91   : > { %v609_v19 = vsel %vm545_vm1, %v466_v14, %v577_v16 }
  0x94   : > { %v467_v15 = vpop.f32.mrf.mxu0 }
  0x95   : > { %v468_v17 = vadd.f32 %v1445_v13, %v467_v15 }
  0x97   : > { %vm546_vm2 = vcmp.gt.f32.partialorder %v468_v17, 0.0  ;;  %v578_v18 = vmul.f32 0.01, %v468_v17 }
  0x99   : > { %v610_v20 = vsel %vm546_vm2, %v468_v17, %v578_v18 }
  0x9a   : > { %v641_v21 = vpack.c.bf16 %v610_v20, %v609_v19 }
  0x9c   : > { %v470_v23 = vpop.f32.mrf.mxu0  ;;  %1273 = vmatmul.msk.bf16.vlgmr.msra.gmra.mxu1 %vm677_vm3, %v641_v21  ;;  %v1335_v21 = vld [vmem:[%s1652_s5 + $0x8] sm:$0xff] }
  0x9d   : > { %v471_v24 = vadd.f32 %v1445_v13, %v470_v23  ;;  %1001 = vmatpush.bf16.msra.mxu2 %v1335_v21  ;;  %1339 = vmatpush.bf16.msra.mxu3 %v1335_v21 }
  0x9f   : > { %1258 = vmatmul.msk.bf16.gmra.mxu0 %vm407_vm0, %v1324_v22  ;;  %v579_v26 = vmul.f32 0.01, %v471_v24  ;;  %vm547_vm4 = vcmp.gt.f32.partialorder %v471_v24, 0.0 }
  0xa1   : > { %v611_v29 = vsel %vm547_vm4, %v471_v24, %v579_v26  ;;  %v1334_v24 = vld [vmem:[%s1652_s5] sm:$0xff] }
  0xa2   : > { %1002 = vmatpush.bf16.msra.mxu2 %v1334_v24  ;;  %1340 = vmatpush.bf16.msra.mxu3 %v1334_v24 }
  0xa4   : > { %v472_v25 = vpop.f32.mrf.mxu0 }
  0xa5   : > { %v473_v27 = vadd.f32 %v1445_v13, %v472_v25 }
  0xa7   : > { %vm548_vm5 = vcmp.gt.f32.partialorder %v473_v27, 0.0  ;;  %v580_v28 = vmul.f32 0.01, %v473_v27 }
  0xa9   : > { %v612_v30 = vsel %vm548_vm5, %v473_v27, %v580_v28 }
  0xaa   : > { %v642_v31 = vpack.c.bf16 %v612_v30, %v611_v29 }
  0xac   : > { %v475_v33 = vpop.f32.mrf.mxu0  ;;  %1274 = vmatmul.msk.bf16.gmra.mxu1 %vm677_vm3, %v642_v31 }
  0xad   : > { %v476_v35 = vadd.f32 %v1445_v13, %v475_v33 }
  0xaf   : > { %1259 = vmatmul.msk.bf16.gmra.mxu0 %vm407_vm0, %v1325_v32  ;;  %v581_v37 = vmul.f32 0.01, %v476_v35  ;;  %vm549_vm6 = vcmp.gt.f32.partialorder %v476_v35, 0.0 }
  0xb1   : > { %v613_v40 = vsel %vm549_vm6, %v476_v35, %v581_v37 }
  0xb4   : > { %v477_v36 = vpop.f32.mrf.mxu0 }
  0xb5   : > { %v478_v38 = vadd.f32 %v1445_v13, %v477_v36 }
  0xb7   : > { %vm550_vm7 = vcmp.gt.f32.partialorder %v478_v38, 0.0  ;;  %v582_v39 = vmul.f32 0.01, %v478_v38 }
  0xb9   : > { %v614_v41 = vsel %vm550_vm7, %v478_v38, %v582_v39 }
  0xba   : > { %v643_v42 = vpack.c.bf16 %v614_v41, %v613_v40  ;;  %v1497_v40 = vld [vmem:[%s1651_s4] ss:$0 sm:$0xff] }
  0xbc   : > { %v480_v44 = vpop.f32.mrf.mxu0  ;;  %1275 = vmatmul.msk.bf16.gmra.mxu1 %vm677_vm3, %v643_v42 }
  0xbd   : > { %v481_v46 = vadd.f32 %v1445_v13, %v480_v44 }
  0xbf   : > { %1260 = vmatmul.msk.bf16.gmra.mxu0 %vm407_vm0, %v1326_v43  ;;  %v583_v48 = vmul.f32 0.01, %v481_v46  ;;  %vm551_vm8 = vcmp.gt.f32.partialorder %v481_v46, 0.0 }
  0xc1   : > { %v615_v51 = vsel %vm551_vm8, %v481_v46, %v583_v48 }
  0xc4   : > { %v482_v47 = vpop.f32.mrf.mxu0 }
  0xc5   : > { %v483_v49 = vadd.f32 %v1445_v13, %v482_v47 }
  0xc7   : > { %vm552_vm9 = vcmp.gt.f32.partialorder %v483_v49, 0.0  ;;  %v584_v50 = vmul.f32 0.01, %v483_v49 }
  0xc9   : > { %v616_v52 = vsel %vm552_vm9, %v483_v49, %v584_v50 }
  0xca   : > { %v644_v53 = vpack.c.bf16 %v616_v52, %v615_v51 }
  0xcc   : > { %v485_v55 = vpop.f32.mrf.mxu0  ;;  %1276 = vmatmul.msk.bf16.gmra.mxu1 %vm677_vm3, %v644_v53 }
  0xcd   : > { %v486_v57 = vadd.f32 %v1445_v13, %v485_v55 }
  0xcf   : > { %1261 = vmatmul.msk.bf16.gmra.mxu0 %vm407_vm0, %v1327_v54  ;;  %v585_v59 = vmul.f32 0.01, %v486_v57  ;;  %vm553_vm10 = vcmp.gt.f32.partialorder %v486_v57, 0.0 }
  0xd1   : > { %v617_v62 = vsel %vm553_vm10, %v486_v57, %v585_v59 }
  0xd4   : > { %v487_v58 = vpop.f32.mrf.mxu0 }
  0xd5   : > { %v488_v60 = vadd.f32 %v1445_v13, %v487_v58 }
  0xd7   : > { %vm554_vm11 = vcmp.gt.f32.partialorder %v488_v60, 0.0  ;;  %v586_v61 = vmul.f32 0.01, %v488_v60 }
  0xd9   : > { %v618_v63 = vsel %vm554_vm11, %v488_v60, %v586_v61 }
  0xda   : > { %v645_v0 = vpack.c.bf16 %v618_v63, %v617_v62 }
  0xdc   : > { %v490_v1 = vpop.f32.mrf.mxu0  ;;  %1277 = vmatmul.msk.bf16.gmra.mxu1 %vm677_vm3, %v645_v0 }
  0xdd   : > { %v491_v2 = vadd.f32 %v1445_v13, %v490_v1 }
  0xdf   : > { %v587_v4 = vmul.f32 0.01, %v491_v2  ;;  %vm555_vm12 = vcmp.gt.f32.partialorder %v491_v2, 0.0 }
  0xe1   : > { %v619_v7 = vsel %vm555_vm12, %v491_v2, %v587_v4 }
  0xe4   : > { %v492_v3 = vpop.f32.mrf.mxu0 }
  0xe5   : > { %v493_v5 = vadd.f32 %v1445_v13, %v492_v3 }
  0xe7   : > { %vm556_vm13 = vcmp.gt.f32.partialorder %v493_v5, 0.0  ;;  %v588_v6 = vmul.f32 0.01, %v493_v5 }
  0xe9   : > { %v620_v8 = vsel %vm556_vm13, %v493_v5, %v588_v6 }
  0xea   : > { %v646_v9 = vpack.c.bf16 %v620_v8, %v619_v7 }
  0xec   : > { %v495_v10 = vpop.f32.mrf.mxu0  ;;  %1278 = vmatmul.msk.bf16.gmra.mxu1 %vm677_vm3, %v646_v9 }
  0xed   : > { %v496_v11 = vadd.f32 %v1445_v13, %v495_v10 }
  0xef   : > { %v589_v14 = vmul.f32 0.01, %v496_v11  ;;  %vm557_vm14 = vcmp.gt.f32.partialorder %v496_v11, 0.0 }
  0xf1   : > { %v621_v17 = vsel %vm557_vm14, %v496_v11, %v589_v14 }
  0xf4   : > { %v497_v12 = vpop.f32.mrf.mxu0 }
  0xf5   : > { %v498_v15 = vadd.f32 %v1445_v13, %v497_v12 }
  0xf7   : > { %vm558_vm15 = vcmp.gt.f32.partialorder %v498_v15, 0.0  ;;  %v590_v16 = vmul.f32 0.01, %v498_v15 }
  0xf9   : > { %v622_v18 = vsel %vm558_vm15, %v498_v15, %v590_v16 }
  0xfa   : > { %v647_v19 = vpack.c.bf16 %v622_v18, %v621_v17 }
  0xfc   : > { %v500_v20 = vpop.f32.mrf.mxu0  ;;  %1279 = vmatmul.msk.bf16.gmra.mxu1 %vm677_vm3, %v647_v19 }
  0xfd   : > { %v501_v22 = vadd.f32 %v1445_v13, %v500_v20 }
  0xff   : > { %v591_v25 = vmul.f32 0.01, %v501_v22  ;;  %vm559_vm0 = vcmp.gt.f32.partialorder %v501_v22, 0.0 }
 0x101   : > { %v623_v28 = vsel %vm559_vm0, %v501_v22, %v591_v25 }
 0x104   : > { %v502_v23 = vpop.f32.mrf.mxu0 }
 0x105   : > { %v503_v26 = vadd.f32 %v1445_v13, %v502_v23 }
 0x107   : > { %vm560_vm1 = vcmp.gt.f32.partialorder %v503_v26, 0.0  ;;  %v592_v27 = vmul.f32 0.01, %v503_v26 }
 0x109   : > { %v624_v29 = vsel %vm560_vm1, %v503_v26, %v592_v27 }
 0x10a   : > { %v648_v30 = vpack.c.bf16 %v624_v29, %v623_v28 }
 0x10c   : > { %v505_v31 = vpop.f32.mrf.mxu0  ;;  %1280 = vmatmul.msk.bf16.gmra.mxu1 %vm677_vm3, %v648_v30 }
 0x10d   : > { %v506_v32 = vadd.f32 %v1445_v13, %v505_v31 }
 0x10f   : > { %v593_v34 = vmul.f32 0.01, %v506_v32  ;;  %vm561_vm2 = vcmp.gt.f32.partialorder %v506_v32, 0.0 }
 0x111   : > { %v625_v38 = vsel %vm561_vm2, %v506_v32, %v593_v34 }
 0x114   : > { %v507_v33 = vpop.f32.mrf.mxu0 }
 0x115   : > { %v508_v35 = vadd.f32 %v1445_v13, %v507_v33  ;;  %v530_v33 = vpop.f32.mrf.mxu3 }
 0x117   : > { %vm562_vm4 = vcmp.gt.f32.partialorder %v508_v35, 0.0  ;;  %v594_v36 = vmul.f32 0.01, %v508_v35 }
 0x119   : > { %v735_v37 = vpop.f32.mrf.mxu1  ;;  %v626_v39 = vsel %vm562_vm4, %v508_v35, %v594_v36 }
 0x11a   : > { %v649_v41 = vpack.c.bf16 %v626_v39, %v625_v38  ;;  %v736_v43 = vadd.f32 %v1497_v40, %v735_v37 }
 0x11c   : > { %v510_v42 = vpop.f32.mrf.mxu0  ;;  %1281 = vmatmul.msk.bf16.gmra.mxu1 %vm677_vm3, %v649_v41  ;;  %v847_v46 = vmul.f32 0.01, %v736_v43  ;;  %vm815_vm5 = vcmp.gt.f32.partialorder %v736_v43, 0.0 }
 0x11d   : > { %v511_v44 = vadd.f32 %v1445_v13, %v510_v42 }
 0x11e   : > { %v879_v52 = vsel %vm815_vm5, %v736_v43, %v847_v46  ;;  %v532_v43 = vpop.f32.mrf.mxu3 }
 0x11f   : > { %v595_v50 = vmul.f32 0.01, %v511_v44  ;;  %vm563_vm7 = vcmp.gt.f32.partialorder %v511_v44, 0.0 }
 0x121   : > { %v737_v45 = vpop.f32.mrf.mxu1  ;;  %v627_v57 = vsel %vm563_vm7, %v511_v44, %v595_v50 }
 0x122   : > { %v738_v47 = vadd.f32 %v1497_v40, %v737_v45 }
 0x124   : > { %vm816_vm6 = vcmp.gt.f32.partialorder %v738_v47, 0.0  ;;  %v848_v48 = vmul.f32 0.01, %v738_v47  ;;  %v512_v49 = vpop.f32.mrf.mxu0 }
 0x125   : > { %v513_v51 = vadd.f32 %v1445_v13, %v512_v49 }
 0x126   : > { %v880_v53 = vsel %vm816_vm6, %v738_v47, %v848_v48 }
 0x127   : > { %vm564_vm8 = vcmp.gt.f32.partialorder %v513_v51, 0.0  ;;  %v596_v54 = vmul.f32 0.01, %v513_v51  ;;  %v911_v55 = vpack.c.bf16 %v880_v53, %v879_v52 }
 0x129   : > { %v740_v56 = vpop.f32.mrf.mxu1  ;;  %1297 = vmatmul.msk.bf16.vlgmr.msra.gmra.mxu2 %vm677_vm3, %v911_v55  ;;  %v628_v58 = vsel %vm564_vm8, %v513_v51, %v596_v54  ;;  %v535_v55 = vpop.f32.mrf.mxu3 }
 0x12a   : > { %v650_v59 = vpack.c.bf16 %v628_v58, %v627_v57  ;;  %v741_v61 = vadd.f32 %v1497_v40, %v740_v56  ;;  %v531_v56 = vadd.f32 %v1445_v13, %v530_v33  ;;  %v533_v57 = vadd.f32 %v1445_v13, %v532_v43 }
 0x12c   : > { %v515_v60 = vpop.f32.mrf.mxu0  ;;  %1282 = vmatmul.msk.bf16.gmra.mxu1 %vm677_vm3, %v650_v59  ;;  %v849_v0 = vmul.f32 0.01, %v741_v61  ;;  %vm817_vm9 = vcmp.gt.f32.partialorder %v741_v61, 0.0  ;;  %vm571_vm7 = vcmp.gt.f32.partialorder %v531_v56, 0.0  ;;  %vm572_vm8 = vcmp.gt.f32.partialorder %v533_v57, 0.0 }
 0x12d   : > { %v516_v62 = vadd.f32 %v1445_v13, %v515_v60 }
 0x12e   : > { %v881_v6 = vsel %vm817_vm9, %v741_v61, %v849_v0  ;;  %v603_v61 = vmul.f32 0.01, %v531_v56 }
 0x12f   : > { %v597_v4 = vmul.f32 0.01, %v516_v62  ;;  %vm565_vm11 = vcmp.gt.f32.partialorder %v516_v62, 0.0 }
 0x131   : > { %v742_v63 = vpop.f32.mrf.mxu1  ;;  %v629_v11 = vsel %vm565_vm11, %v516_v62, %v597_v4  ;;  %v604_v62 = vmul.f32 0.01, %v533_v57 }
 0x132   : > { %v743_v1 = vadd.f32 %v1497_v40, %v742_v63 }
 0x133   : > { %v636_v4 = vsel %vm572_vm8, %v533_v57, %v604_v62 }
 0x134   : > { %vm818_vm10 = vcmp.gt.f32.partialorder %v743_v1, 0.0  ;;  %v850_v2 = vmul.f32 0.01, %v743_v1  ;;  %v517_v3 = vpop.f32.mrf.mxu0 }
 0x135   : > { %v518_v5 = vadd.f32 %v1445_v13, %v517_v3  ;;  %v635_v3 = vsel %vm571_vm7, %v531_v56, %v603_v61  ;;  %v1552_v61 = vld [vmem:[%s1653_s6] ss:$0 sm:$0xff] }
 0x136   : > { %v882_v7 = vsel %vm818_vm10, %v743_v1, %v850_v2 }
 0x137   : > { %vm566_vm12 = vcmp.gt.f32.partialorder %v518_v5, 0.0  ;;  %v598_v8 = vmul.f32 0.01, %v518_v5  ;;  %v912_v9 = vpack.c.bf16 %v882_v7, %v881_v6  ;;  %v654_v7 = vpack.c.bf16 %v636_v4, %v635_v3 }
 0x139   : > { %v745_v10 = vpop.f32.mrf.mxu1  ;;  %1298 = vmatmul.msk.bf16.gmra.mxu2 %vm677_vm3, %v912_v9  ;;  %v630_v12 = vsel %vm566_vm12, %v518_v5, %v598_v8  ;;  %v537_v5 = vpop.f32.mrf.mxu3  ;;  %v536_v9 = vadd.f32 %v1445_v13, %v535_v55 }
 0x13a   : > { %v651_v14 = vpack.c.bf16 %v630_v12, %v629_v11  ;;  %v746_v16 = vadd.f32 %v1497_v40, %v745_v10  ;;  %v538_v10 = vadd.f32 %v1445_v13, %v537_v5 }
 0x13b   : > { %vm573_vm11 = vcmp.gt.f32.partialorder %v536_v9, 0.0 }
 0x13c   : > { %v520_v15 = vpop.f32.mrf.mxu0  ;;  %1283 = vmatmul.msk.bf16.gmra.mxu1 %vm677_vm3, %v651_v14  ;;  %v851_v19 = vmul.f32 0.01, %v746_v16  ;;  %vm819_vm13 = vcmp.gt.f32.partialorder %v746_v16, 0.0  ;;  %vm574_vm12 = vcmp.gt.f32.partialorder %v538_v10, 0.0 }
 0x13d   : > { %v521_v17 = vadd.f32 %v1445_v13, %v520_v15 }
 0x13e   : > { %v883_v25 = vsel %vm819_vm13, %v746_v16, %v851_v19  ;;  %v605_v16 = vmul.f32 0.01, %v536_v9 }
 0x13f   : > { %v599_v23 = vmul.f32 0.01, %v521_v17  ;;  %vm567_vm15 = vcmp.gt.f32.partialorder %v521_v17, 0.0 }
 0x141   : > { %v747_v18 = vpop.f32.mrf.mxu1  ;;  %v631_v30 = vsel %vm567_vm15, %v521_v17, %v599_v23  ;;  %v540_v15 = vpop.f32.mrf.mxu3  ;;  %v606_v17 = vmul.f32 0.01, %v538_v10 }
 0x142   : > { %v748_v20 = vadd.f32 %v1497_v40, %v747_v18 }
 0x143   : > { %v638_v23 = vsel %vm574_vm12, %v538_v10, %v606_v17 }
 0x144   : > { %vm820_vm14 = vcmp.gt.f32.partialorder %v748_v20, 0.0  ;;  %v852_v21 = vmul.f32 0.01, %v748_v20  ;;  %v522_v22 = vpop.f32.mrf.mxu0 }
 0x145   : > { %v523_v24 = vadd.f32 %v1445_v13, %v522_v22  ;;  %v637_v22 = vsel %vm573_vm11, %v536_v9, %v605_v16 }
 0x146   : > { %v884_v26 = vsel %vm820_vm14, %v748_v20, %v852_v21 }
 0x147   : > { %vm568_vm0 = vcmp.gt.f32.partialorder %v523_v24, 0.0  ;;  %v600_v27 = vmul.f32 0.01, %v523_v24  ;;  %v913_v28 = vpack.c.bf16 %v884_v26, %v883_v25  ;;  %v655_v25 = vpack.c.bf16 %v638_v23, %v637_v22 }
 0x149   : > { %v750_v29 = vpop.f32.mrf.mxu1  ;;  %1299 = vmatmul.msk.bf16.gmra.mxu2 %vm677_vm3, %v913_v28  ;;  %v632_v31 = vsel %vm568_vm0, %v523_v24, %v600_v27  ;;  %v542_v26 = vpop.f32.mrf.mxu3  ;;  %v541_v28 = vadd.f32 %v1445_v13, %v540_v15 }
 0x14a   : > { %v652_v32 = vpack.c.bf16 %v632_v31, %v631_v30  ;;  %v751_v35 = vadd.f32 %v1497_v40, %v750_v29  ;;  %v543_v29 = vadd.f32 %v1445_v13, %v542_v26 }
 0x14b   : > { %v607_v33 = vmul.f32 0.01, %v541_v28  ;;  %vm575_vm15 = vcmp.gt.f32.partialorder %v541_v28, 0.0 }
 0x14c   : > { %v525_v34 = vpop.f32.mrf.mxu0  ;;  %1284 = vmatmul.msk.bf16.gmra.mxu1 %vm677_vm3, %v652_v32  ;;  %v853_v38 = vmul.f32 0.01, %v751_v35  ;;  %vm821_vm1 = vcmp.gt.f32.partialorder %v751_v35, 0.0  ;;  %vm576_vm0 = vcmp.gt.f32.partialorder %v543_v29, 0.0 }
 0x14d   : > { %v526_v36 = vadd.f32 %v1445_v13, %v525_v34  ;;  %v608_v34 = vmul.f32 0.01, %v543_v29 }
 0x14e   : > { %v885_v46 = vsel %vm821_vm1, %v751_v35, %v853_v38 }
 0x14f   : > { %v601_v44 = vmul.f32 0.01, %v526_v36  ;;  %vm569_vm4 = vcmp.gt.f32.partialorder %v526_v36, 0.0 }
 0x151   : > { %v752_v37 = vpop.f32.mrf.mxu1  ;;  %v633_v50 = vsel %vm569_vm4, %v526_v36, %v601_v44 }
 0x152   : > { %v753_v39 = vadd.f32 %v1497_v40, %v752_v37 }
 0x154   : > { %vm822_vm2 = vcmp.gt.f32.partialorder %v753_v39, 0.0  ;;  %v854_v41 = vmul.f32 0.01, %v753_v39  ;;  %v527_v42 = vpop.f32.mrf.mxu0 }
 0x155   : > { %v528_v45 = vadd.f32 %v1445_v13, %v527_v42 }
 0x156   : > { %v886_v47 = vsel %vm822_vm2, %v753_v39, %v854_v41  ;;  %v639_v39 = vsel %vm575_vm15, %v541_v28, %v607_v33  ;;  %v640_v41 = vsel %vm576_vm0, %v543_v29, %v608_v34 }
 0x157   : > { %vm570_vm5 = vcmp.gt.f32.partialorder %v528_v45, 0.0  ;;  %v602_v48 = vmul.f32 0.01, %v528_v45  ;;  %v914_v49 = vpack.c.bf16 %v886_v47, %v885_v46  ;;  %v656_v13 = vpack.c.bf16 %v640_v41, %v639_v39 }
 0x159   : > { %v634_v51 = vsel %vm570_vm5, %v528_v45, %v602_v48  ;;  %v755_v52 = vpop.f32.mrf.mxu1  ;;  %1300 = vmatmul.msk.bf16.gmra.mxu2 %vm677_vm3, %v914_v49 }
 0x15a   : > { %v653_v53 = vpack.c.bf16 %v634_v51, %v633_v50  ;;  %v756_v54 = vadd.f32 %v1497_v40, %v755_v52 }
 0x15c   : > { %1285 = vmatmul.msk.bf16.vlgmr.msrb.gmra.mxu3 %vm677_vm3, %v653_v53  ;;  %v855_v59 = vmul.f32 0.01, %v756_v54  ;;  %vm823_vm6 = vcmp.gt.f32.partialorder %v756_v54, 0.0 }
 0x15e   : > { %v887_v0 = vsel %vm823_vm6, %v756_v54, %v855_v59 }
 0x161   : > { %v757_v58 = vpop.f32.mrf.mxu1 }
 0x162   : > { %v758_v60 = vadd.f32 %v1497_v40, %v757_v58 }
 0x164   : > { %vm824_vm9 = vcmp.gt.f32.partialorder %v758_v60, 0.0  ;;  %v856_v63 = vmul.f32 0.01, %v758_v60 }
 0x166   : > { %v888_v1 = vsel %vm824_vm9, %v758_v60, %v856_v63 }
 0x167   : > { %v915_v2 = vpack.c.bf16 %v888_v1, %v887_v0 }
 0x169   : > { %v760_v6 = vpop.f32.mrf.mxu1  ;;  %1301 = vmatmul.msk.bf16.gmra.mxu2 %vm677_vm3, %v915_v2 }
 0x16a   : > { %v761_v8 = vadd.f32 %v1497_v40, %v760_v6 }
 0x16c   : > { %1286 = vmatmul.msk.bf16.gmra.mxu3 %vm677_vm3, %v654_v7  ;;  %v857_v12 = vmul.f32 0.01, %v761_v8  ;;  %vm825_vm10 = vcmp.gt.f32.partialorder %v761_v8, 0.0 }
 0x16e   : > { %v889_v19 = vsel %vm825_vm10, %v761_v8, %v857_v12 }
 0x171   : > { %v762_v11 = vpop.f32.mrf.mxu1 }
 0x172   : > { %v763_v14 = vadd.f32 %v1497_v40, %v762_v11 }
 0x174   : > { %vm826_vm13 = vcmp.gt.f32.partialorder %v763_v14, 0.0  ;;  %v858_v18 = vmul.f32 0.01, %v763_v14 }
 0x176   : > { %v890_v20 = vsel %vm826_vm13, %v763_v14, %v858_v18 }
 0x177   : > { %v916_v21 = vpack.c.bf16 %v890_v20, %v889_v19 }
 0x179   : > { %v765_v24 = vpop.f32.mrf.mxu1  ;;  %1302 = vmatmul.msk.bf16.gmra.mxu2 %vm677_vm3, %v916_v21 }
 0x17a   : > { %v766_v27 = vadd.f32 %v1497_v40, %v765_v24 }
 0x17c   : > { %1287 = vmatmul.msk.bf16.gmra.mxu3 %vm677_vm3, %v655_v25  ;;  %v859_v31 = vmul.f32 0.01, %v766_v27  ;;  %vm827_vm14 = vcmp.gt.f32.partialorder %v766_v27, 0.0 }
 0x17e   : > { %v891_v36 = vsel %vm827_vm14, %v766_v27, %v859_v31 }
 0x181   : > { %v767_v30 = vpop.f32.mrf.mxu1 }
 0x182   : > { %v768_v32 = vadd.f32 %v1497_v40, %v767_v30 }
 0x184   : > { %vm828_vm1 = vcmp.gt.f32.partialorder %v768_v32, 0.0  ;;  %v860_v35 = vmul.f32 0.01, %v768_v32 }
 0x186   : > { %v892_v37 = vsel %vm828_vm1, %v768_v32, %v860_v35 }
 0x187   : > { %v917_v38 = vpack.c.bf16 %v892_v37, %v891_v36 }
 0x189   : > { %v770_v42 = vpop.f32.mrf.mxu1  ;;  %1303 = vmatmul.msk.bf16.gmra.mxu2 %vm677_vm3, %v917_v38 }
 0x18a   : > { %v771_v43 = vadd.f32 %v1497_v40, %v770_v42 }
 0x18c   : > { %1288 = vmatmul.msk.bf16.gmra.mxu3 %vm677_vm3, %v656_v13  ;;  %v861_v45 = vmul.f32 0.01, %v771_v43  ;;  %vm829_vm2 = vcmp.gt.f32.partialorder %v771_v43, 0.0 }
 0x18e   : > { %v893_v48 = vsel %vm829_vm2, %v771_v43, %v861_v45 }
 0x191   : > { %v772_v44 = vpop.f32.mrf.mxu1 }
 0x192   : > { %v773_v46 = vadd.f32 %v1497_v40, %v772_v44 }
 0x194   : > { %vm830_vm4 = vcmp.gt.f32.partialorder %v773_v46, 0.0  ;;  %v862_v47 = vmul.f32 0.01, %v773_v46 }
 0x196   : > { %v894_v49 = vsel %vm830_vm4, %v773_v46, %v862_v47 }
 0x197   : > { %v918_v50 = vpack.c.bf16 %v894_v49, %v893_v48 }
 0x199   : > { %v775_v51 = vpop.f32.mrf.mxu1  ;;  %1304 = vmatmul.msk.bf16.gmra.mxu2 %vm677_vm3, %v918_v50 }
 0x19a   : > { %v776_v52 = vadd.f32 %v1497_v40, %v775_v51 }
 0x19c   : > { %v863_v54 = vmul.f32 0.01, %v776_v52  ;;  %vm831_vm5 = vcmp.gt.f32.partialorder %v776_v52, 0.0 }
 0x19e   : > { %v895_v57 = vsel %vm831_vm5, %v776_v52, %v863_v54 }
 0x1a1   : > { %v777_v53 = vpop.f32.mrf.mxu1 }
 0x1a2   : > { %v778_v55 = vadd.f32 %v1497_v40, %v777_v53 }
 0x1a4   : > { %vm832_vm6 = vcmp.gt.f32.partialorder %v778_v55, 0.0  ;;  %v864_v56 = vmul.f32 0.01, %v778_v55 }
 0x1a6   : > { %v896_v58 = vsel %vm832_vm6, %v778_v55, %v864_v56 }
 0x1a7   : > { %v919_v59 = vpack.c.bf16 %v896_v58, %v895_v57 }
 0x1a9   : > { %v780_v60 = vpop.f32.mrf.mxu1  ;;  %1305 = vmatmul.msk.bf16.gmra.mxu2 %vm677_vm3, %v919_v59 }
 0x1aa   : > { %v781_v0 = vadd.f32 %v1497_v40, %v780_v60 }
 0x1ac   : > { %v1004_v62 = vpop.f32.mrf.mxu2  ;;  %v865_v2 = vmul.f32 0.01, %v781_v0  ;;  %vm833_vm7 = vcmp.gt.f32.partialorder %v781_v0, 0.0 }
 0x1ad   : > { %v1005_v63 = vadd.f32 %v1552_v61, %v1004_v62 }
 0x1ae   : > { %v897_v7 = vsel %vm833_vm7, %v781_v0, %v865_v2 }
 0x1af   : > { %1084 = vst [vmem:[%s1557_s29] sm:$0xff] %v1005_v63 }
 0x1b1   : > { %v782_v1 = vpop.f32.mrf.mxu1 }
 0x1b2   : > { %v783_v3 = vadd.f32 %v1497_v40, %v782_v1 }
 0x1b4   : > { %vm834_vm8 = vcmp.gt.f32.partialorder %v783_v3, 0.0  ;;  %v866_v4 = vmul.f32 0.01, %v783_v3  ;;  %v1006_v5 = vpop.f32.mrf.mxu2 }
 0x1b5   : > { %v1007_v6 = vadd.f32 %v1552_v61, %v1006_v5 }
 0x1b6   : > { %v898_v8 = vsel %vm834_vm8, %v783_v3, %v866_v4 }
 0x1b7   : > { %1085 = vst [vmem:[%s1557_s29 + $0x8] sm:$0xff] %v1007_v6  ;;  %v920_v9 = vpack.c.bf16 %v898_v8, %v897_v7 }
 0x1b9   : > { %v785_v10 = vpop.f32.mrf.mxu1  ;;  %1306 = vmatmul.msk.bf16.gmra.mxu2 %vm677_vm3, %v920_v9 }
 0x1ba   : > { %v786_v14 = vadd.f32 %v1497_v40, %v785_v10 }
 0x1bc   : > { %v1009_v11 = vpop.f32.mrf.mxu2  ;;  %v867_v16 = vmul.f32 0.01, %v786_v14  ;;  %vm835_vm9 = vcmp.gt.f32.partialorder %v786_v14, 0.0 }
 0x1bd   : > { %v1010_v12 = vadd.f32 %v1552_v61, %v1009_v11 }
 0x1be   : > { %v899_v21 = vsel %vm835_vm9, %v786_v14, %v867_v16 }
 0x1bf   : > { %1086 = vst [vmem:[%s1557_s29 + $0x10] sm:$0xff] %v1010_v12 }
 0x1c1   : > { %v787_v15 = vpop.f32.mrf.mxu1 }
 0x1c2   : > { %v788_v17 = vadd.f32 %v1497_v40, %v787_v15 }
 0x1c4   : > { %vm836_vm10 = vcmp.gt.f32.partialorder %v788_v17, 0.0  ;;  %v868_v18 = vmul.f32 0.01, %v788_v17  ;;  %v1011_v19 = vpop.f32.mrf.mxu2 }
 0x1c5   : > { %v1012_v20 = vadd.f32 %v1552_v61, %v1011_v19 }
 0x1c6   : > { %v900_v22 = vsel %vm836_vm10, %v788_v17, %v868_v18 }
 0x1c7   : > { %1087 = vst [vmem:[%s1557_s29 + $0x18] sm:$0xff] %v1012_v20  ;;  %v921_v23 = vpack.c.bf16 %v900_v22, %v899_v21 }
 0x1c9   : > { %v790_v24 = vpop.f32.mrf.mxu1  ;;  %1307 = vmatmul.msk.bf16.gmra.mxu2 %vm677_vm3, %v921_v23 }
 0x1ca   : > { %v791_v27 = vadd.f32 %v1497_v40, %v790_v24 }
 0x1cc   : > { %v1014_v25 = vpop.f32.mrf.mxu2  ;;  %v869_v29 = vmul.f32 0.01, %v791_v27  ;;  %vm837_vm11 = vcmp.gt.f32.partialorder %v791_v27, 0.0 }
 0x1cd   : > { %v1015_v26 = vadd.f32 %v1552_v61, %v1014_v25 }
 0x1ce   : > { %v901_v34 = vsel %vm837_vm11, %v791_v27, %v869_v29 }
 0x1cf   : > { %1088 = vst [vmem:[%s1557_s29 + $0x20] sm:$0xff] %v1015_v26 }
 0x1d1   : > { %v792_v28 = vpop.f32.mrf.mxu1 }
 0x1d2   : > { %v793_v30 = vadd.f32 %v1497_v40, %v792_v28 }
 0x1d4   : > { %vm838_vm12 = vcmp.gt.f32.partialorder %v793_v30, 0.0  ;;  %v870_v31 = vmul.f32 0.01, %v793_v30  ;;  %v1016_v32 = vpop.f32.mrf.mxu2 }
 0x1d5   : > { %v1017_v33 = vadd.f32 %v1552_v61, %v1016_v32 }
 0x1d6   : > { %v902_v35 = vsel %vm838_vm12, %v793_v30, %v870_v31 }
 0x1d7   : > { %1089 = vst [vmem:[%s1557_s29 + $0x28] sm:$0xff] %v1017_v33  ;;  %v922_v36 = vpack.c.bf16 %v902_v35, %v901_v34 }
 0x1d9   : > { %1308 = vmatmul.msk.bf16.gmra.mxu2 %vm677_vm3, %v922_v36 }
 0x1dc   : > { %v1019_v37 = vpop.f32.mrf.mxu2 }
 0x1dd   : > { %v1020_v38 = vadd.f32 %v1552_v61, %v1019_v37 }
 0x1df   : > { %1090 = vst [vmem:[%s1557_s29 + $0x30] sm:$0xff] %v1020_v38  ;;  %v795_v39 = vpop.f32.mrf.mxu3 }
 0x1e0   : > { %v796_v41 = vadd.f32 %v1497_v40, %v795_v39 }
 0x1e2   : > { %v871_v44 = vmul.f32 0.01, %v796_v41  ;;  %vm839_vm13 = vcmp.gt.f32.partialorder %v796_v41, 0.0 }
 0x1e4   : > { %v1021_v42 = vpop.f32.mrf.mxu2  ;;  %v903_v47 = vsel %vm839_vm13, %v796_v41, %v871_v44 }
 0x1e5   : > { %v1022_v13 = vadd.f32 %v1552_v61, %v1021_v42 }
 0x1e7   : > { %1091 = vst [vmem:[%s1557_s29 + $0x38] sm:$0xff] %v1022_v13  ;;  %v797_v43 = vpop.f32.mrf.mxu3 }
 0x1e8   : > { %v798_v45 = vadd.f32 %v1497_v40, %v797_v43 }
 0x1ea   : > { %vm840_vm14 = vcmp.gt.f32.partialorder %v798_v45, 0.0  ;;  %v872_v46 = vmul.f32 0.01, %v798_v45 }
 0x1ec   : > { %v904_v48 = vsel %vm840_vm14, %v798_v45, %v872_v46  ;;  %v1024_v49 = vpop.f32.mrf.mxu2 }
 0x1ed   : > { %v923_v50 = vpack.c.bf16 %v904_v48, %v903_v47  ;;  %v1025_v51 = vadd.f32 %v1552_v61, %v1024_v49 }
 0x1ef   : > { %1092 = vst [vmem:[%s1557_s29 + $0x40] sm:$0xff] %v1025_v51  ;;  %v800_v52 = vpop.f32.mrf.mxu3  ;;  %1309 = vmatmul.msk.bf16.vlgmr.msra.gmra.mxu3 %vm677_vm3, %v923_v50 }
 0x1f0   : > { %v801_v53 = vadd.f32 %v1497_v40, %v800_v52 }
 0x1f2   : > { %v873_v57 = vmul.f32 0.01, %v801_v53  ;;  %vm841_vm15 = vcmp.gt.f32.partialorder %v801_v53, 0.0 }
 0x1f4   : > { %v1026_v54 = vpop.f32.mrf.mxu2  ;;  %v905_v62 = vsel %vm841_vm15, %v801_v53, %v873_v57 }
 0x1f5   : > { %v1027_v55 = vadd.f32 %v1552_v61, %v1026_v54 }
 0x1f7   : > { %1093 = vst [vmem:[%s1557_s29 + $0x48] sm:$0xff] %v1027_v55  ;;  %v802_v56 = vpop.f32.mrf.mxu3 }
 0x1f8   : > { %v803_v58 = vadd.f32 %v1497_v40, %v802_v56 }
 0x1fa   : > { %vm842_vm0 = vcmp.gt.f32.partialorder %v803_v58, 0.0  ;;  %v874_v59 = vmul.f32 0.01, %v803_v58 }
 0x1fc   : > { %v1029_v60 = vpop.f32.mrf.mxu2  ;;  %v906_v63 = vsel %vm842_vm0, %v803_v58, %v874_v59 }
 0x1fd   : > { %v1030_v0 = vadd.f32 %v1552_v61, %v1029_v60  ;;  %v924_v1 = vpack.c.bf16 %v906_v63, %v905_v62 }
 0x1ff   : > { %1094 = vst [vmem:[%s1557_s29 + $0x50] sm:$0xff] %v1030_v0  ;;  %v805_v2 = vpop.f32.mrf.mxu3  ;;  %1310 = vmatmul.msk.bf16.gmra.mxu3 %vm677_vm3, %v924_v1 }
 0x200   : > { %v806_v3 = vadd.f32 %v1497_v40, %v805_v2 }
 0x202   : > { %v875_v7 = vmul.f32 0.01, %v806_v3  ;;  %vm843_vm1 = vcmp.gt.f32.partialorder %v806_v3, 0.0 }
 0x204   : > { %v1031_v4 = vpop.f32.mrf.mxu2  ;;  %v907_v11 = vsel %vm843_vm1, %v806_v3, %v875_v7 }
 0x205   : > { %v1032_v5 = vadd.f32 %v1552_v61, %v1031_v4 }
 0x207   : > { %1095 = vst [vmem:[%s1557_s29 + $0x58] sm:$0xff] %v1032_v5  ;;  %v807_v6 = vpop.f32.mrf.mxu3 }
 0x208   : > { %v808_v8 = vadd.f32 %v1497_v40, %v807_v6 }
 0x20a   : > { %vm844_vm2 = vcmp.gt.f32.partialorder %v808_v8, 0.0  ;;  %v876_v9 = vmul.f32 0.01, %v808_v8 }
 0x20c   : > { %v1034_v10 = vpop.f32.mrf.mxu2  ;;  %v908_v12 = vsel %vm844_vm2, %v808_v8, %v876_v9 }
 0x20d   : > { %v1035_v14 = vadd.f32 %v1552_v61, %v1034_v10  ;;  %v925_v15 = vpack.c.bf16 %v908_v12, %v907_v11 }
 0x20f   : > { %1096 = vst [vmem:[%s1557_s29 + $0x60] sm:$0xff] %v1035_v14  ;;  %v810_v16 = vpop.f32.mrf.mxu3  ;;  %1311 = vmatmul.msk.bf16.gmra.mxu3 %vm677_vm3, %v925_v15 }
 0x210   : > { %v811_v17 = vadd.f32 %v1497_v40, %v810_v16 }
 0x212   : > { %v877_v21 = vmul.f32 0.01, %v811_v17  ;;  %vm845_vm4 = vcmp.gt.f32.partialorder %v811_v17, 0.0 }
 0x214   : > { %v1036_v18 = vpop.f32.mrf.mxu2  ;;  %v909_v25 = vsel %vm845_vm4, %v811_v17, %v877_v21 }
 0x215   : > { %v1037_v19 = vadd.f32 %v1552_v61, %v1036_v18 }
 0x217   : > { %1097 = vst [vmem:[%s1557_s29 + $0x68] sm:$0xff] %v1037_v19  ;;  %v812_v20 = vpop.f32.mrf.mxu3 }
 0x218   : > { %v813_v22 = vadd.f32 %v1497_v40, %v812_v20 }
 0x21a   : > { %vm846_vm5 = vcmp.gt.f32.partialorder %v813_v22, 0.0  ;;  %v878_v23 = vmul.f32 0.01, %v813_v22 }
 0x21c   : > { %v1039_v24 = vpop.f32.mrf.mxu2  ;;  %v910_v26 = vsel %vm846_vm5, %v813_v22, %v878_v23 }
 0x21d   : > { %v1040_v27 = vadd.f32 %v1552_v61, %v1039_v24  ;;  %v926_v28 = vpack.c.bf16 %v910_v26, %v909_v25 }
 0x21f   : > { %1098 = vst [vmem:[%s1557_s29 + $0x70] sm:$0xff] %v1040_v27  ;;  %1312 = vmatmul.msk.bf16.gmra.mxu3 %vm677_vm3, %v926_v28 }
 0x224   : > { %v1041_v29 = vpop.f32.mrf.mxu2 }
 0x225   : > { %v1042_v30 = vadd.f32 %v1552_v61, %v1041_v29 }
 0x227   : > { %1099 = vst [vmem:[%s1557_s29 + $0x78] sm:$0xff] %v1042_v30 }
 0x22c   : > { %v1044_v40 = vpop.f32.mrf.mxu2 }
 0x22d   : > { %v1045_v31 = vadd.f32 %v1552_v61, %v1044_v40 }
 0x22f   : > { %1100 = vst [vmem:[%s1557_s29 + $0x80] sm:$0xff] %v1045_v31 }
 0x234   : > { %v1046_v32 = vpop.f32.mrf.mxu2 }
 0x235   : > { %v1047_v33 = vadd.f32 %v1552_v61, %v1046_v32 }
 0x237   : > { %1101 = vst [vmem:[%s1557_s29 + $0x88] sm:$0xff] %v1047_v33 }
 0x23c   : > { %v1049_v34 = vpop.f32.mrf.mxu2 }
 0x23d   : > { %v1050_v35 = vadd.f32 %v1552_v61, %v1049_v34 }
 0x23f   : > { %1102 = vst [vmem:[%s1557_s29 + $0x90] sm:$0xff] %v1050_v35 }
 0x244   : > { %v1051_v36 = vpop.f32.mrf.mxu2 }
 0x245   : > { %v1052_v37 = vadd.f32 %v1552_v61, %v1051_v36 }
 0x247   : > { %1103 = vst [vmem:[%s1557_s29 + $0x98] sm:$0xff] %v1052_v37 }
 0x24c   : > { %v1054_v38 = vpop.f32.mrf.mxu2 }
 0x24d   : > { %v1055_v39 = vadd.f32 %v1552_v61, %v1054_v38 }
 0x24f   : > { %1104 = vst [vmem:[%s1557_s29 + $0xa0] sm:$0xff] %v1055_v39 }
 0x254   : > { %v1056_v41 = vpop.f32.mrf.mxu2 }
 0x255   : > { %v1057_v42 = vadd.f32 %v1552_v61, %v1056_v41 }
 0x257   : > { %1105 = vst [vmem:[%s1557_s29 + $0xa8] sm:$0xff] %v1057_v42 }
 0x25c   : > { %v1059_v13 = vpop.f32.mrf.mxu2 }
 0x25d   : > { %v1060_v43 = vadd.f32 %v1552_v61, %v1059_v13 }
 0x25f   : > { %1106 = vst [vmem:[%s1557_s29 + $0xb0] sm:$0xff] %v1060_v43 }
 0x264   : > { %v1061_v44 = vpop.f32.mrf.mxu2 }
 0x265   : > { %v1062_v45 = vadd.f32 %v1552_v61, %v1061_v44 }
 0x267   : > { %1107 = vst [vmem:[%s1557_s29 + $0xb8] sm:$0xff] %v1062_v45 }
 0x272   : > { %v1064_v46 = vpop.f32.mrf.mxu3 }
 0x273   : > { %v1065_v47 = vadd.f32 %v1552_v61, %v1064_v46 }
 0x275   : > { %1108 = vst [vmem:[%s1557_s29 + $0xc0] sm:$0xff] %v1065_v47 }
 0x27a   : > { %v1066_v48 = vpop.f32.mrf.mxu3 }
 0x27b   : > { %v1067_v49 = vadd.f32 %v1552_v61, %v1066_v48 }
 0x27d   : > { %1109 = vst [vmem:[%s1557_s29 + $0xc8] sm:$0xff] %v1067_v49 }
 0x282   : > { %v1069_v50 = vpop.f32.mrf.mxu3 }
 0x283   : > { %v1070_v51 = vadd.f32 %v1552_v61, %v1069_v50 }
 0x285   : > { %1110 = vst [vmem:[%s1557_s29 + $0xd0] sm:$0xff] %v1070_v51 }
 0x28a   : > { %v1071_v52 = vpop.f32.mrf.mxu3 }
 0x28b   : > { %v1072_v53 = vadd.f32 %v1552_v61, %v1071_v52 }
 0x28d   : > { %1111 = vst [vmem:[%s1557_s29 + $0xd8] sm:$0xff] %v1072_v53 }
 0x292   : > { %v1074_v54 = vpop.f32.mrf.mxu3 }
 0x293   : > { %v1075_v55 = vadd.f32 %v1552_v61, %v1074_v54 }
 0x295   : > { %1112 = vst [vmem:[%s1557_s29 + $0xe0] sm:$0xff] %v1075_v55 }
 0x29a   : > { %v1076_v56 = vpop.f32.mrf.mxu3 }
 0x29b   : > { %v1077_v57 = vadd.f32 %v1552_v61, %v1076_v56 }
 0x29d   : > { %1113 = vst [vmem:[%s1557_s29 + $0xe8] sm:$0xff] %v1077_v57 }
 0x2a2   : > { %v1079_v58 = vpop.f32.mrf.mxu3 }
 0x2a3   : > { %v1080_v59 = vadd.f32 %v1552_v61, %v1079_v58 }
 0x2a5   : > { %1114 = vst [vmem:[%s1557_s29 + $0xf0] sm:$0xff] %v1080_v59 }
 0x2aa   : > { %v1081_v60 = vpop.f32.mrf.mxu3 }
 0x2ab   : > { %v1082_v62 = vadd.f32 %v1552_v61, %v1081_v60 }
 0x2ad   : > { %1115 = vst [vmem:[%s1557_s29 + $0xf8] sm:$0xff] %v1082_v62 }
 0x2ae PF: > { %s17_s24 = sadd.s32 1, %s1358_s24  }
 0x2af   : > { %p14_p4 = scmp.ge.s32.totalorder %s17_s24, 6  }
 0x2b1   :  { %16 = sbr.rel (!%p14_p4) target bundleno = 1 (0x1), region = 78 }

</bundles_post_ra>
